<compile_context>
chip_gen: v7x
topology: tpu7x:2x2x1
jax: 0.10.0
libtpu: 0.0.40
codegen_flags: <defaults>
</compile_context>

<pallas_src>
import functools

import numpy as np
import jax
import jax.numpy as jnp
from jax.experimental import pallas as pl
from jax.experimental.pallas import tpu as pltpu


def _round_up(x, m):
    return ((x + m - 1) // m) * m


def _vmem_capacity_bytes():
    """Chip-aware VMEM capacity (v7x: 64 MiB/TC, v5e/v6e: 128 MiB); conservative fallback."""
    try:
        info = pltpu.get_tpu_info()
        cap = int(getattr(info, "vmem_capacity_bytes", 0))
        if cap > 0:
            return cap
    except Exception:
        pass
    return 64 << 20  # assume the smallest (v7x) if the query is unavailable


def _choose_batch_tile(B, F, P, E, A, stream_itemsize, tb_max=4096):
    """Pick the batch tile (lane axis, multiple of 128) from a padding-aware VMEM model."""
    vmem_cap = _vmem_capacity_bytes()
    vmem_limit = min((vmem_cap * 3) // 4, 96 << 20)   # ~48 MiB on v7x, 96 MiB on v5e/v6e
    budget = vmem_limit // 2                          # headroom for compiler scratch/spills

    sub = 16 if stream_itemsize == 2 else 8           # sublane packing of the streamed dtype
    # Every live buffer is lane-dense in TB (TB is a multiple of 128), so VMEM cost is
    # linear in TB; padding only hits the sublane (second-minor) dims, modeled here.
    per_row = (
        2 * F * _round_up(E, sub) * stream_itemsize   # emb block, double-buffered
        + 2 * 8 * 4                                   # lin block (1 -> 8 sublanes), dbuf
        + 2 * 8 * 4                                   # out block, dbuf
        + F * _round_up(E, 8) * 4                     # f32 upcast of the emb tile
        + 3 * _round_up(P, 8) * 4                     # scores / exp / attn
        + _round_up(E, 8) * 4                         # attention-weighted accumulator
        + _round_up(A, 8) * 4                         # attention hidden transient
        + 64                                          # slack
    )
    tb = budget // max(per_row, 1)
    tb = min(tb, tb_max)
    # Keep >= 8 grid steps when the batch allows it (megacore split + pipeline depth).
    if B >= 8 * 128:
        tb = min(tb, max(128, (B // 8) // 128 * 128))
    tb = max(128, (tb // 128) * 128)                  # lane-dense: multiple of 128
    tb = min(tb, _round_up(B, 128))                   # never exceed the padded batch
    return int(tb), int(vmem_limit)


def afm_kernel(emb_ref,       # VMEM (F, E, TB)  streamed embeddings, batch on lanes
               lin_ref,       # VMEM (1, TB)     pre-summed linear term (+ lin_bias + fc_b)
               attn_wt_ref,   # VMEM (A, E)      attention weight, transposed
               attn_b_ref,    # VMEM (A, 1)      attention bias (column)
               proj_w_ref,    # VMEM (A, 1)      attention projection weight (column)
               fc_w_ref,      # VMEM (E, 1)      final FC weight (column)
               out_ref,       # VMEM (1, TB)     sigmoid output, lane-dense
               *, pairs):
    F, E, TB = emb_ref.shape

    # Upcast once right after load (v5e VPU has no bf16); everything below is f32 and
    # lane-dense along TB.
    emb = [emb_ref[f].astype(jnp.float32) for f in range(F)]     # F x (E, TB)
    wt = attn_wt_ref[...]                                        # (A, E)
    b_col = attn_b_ref[...]                                      # (A, 1)
    p_col = proj_w_ref[...]                                      # (A, 1)

    # Pass 1: pair interaction -> attention logit, one (1, TB) row per pair.
    score_rows = []
    for (i, j) in pairs:
        ip_p = emb[i] * emb[j]                                           # (E, TB)
        h_p = jnp.dot(wt, ip_p, preferred_element_type=jnp.float32)      # (A, TB) MXU
        h_p = jnp.maximum(h_p + b_col, 0.0)
        score_rows.append(jnp.sum(h_p * p_col, axis=0, keepdims=True))   # (1, TB)
    # The projection bias is constant over pairs and cancels in the softmax -> dropped.
    scores = jnp.concatenate(score_rows, axis=0)                         # (P, TB)

    # Softmax over the pair (sublane) axis; EUP approximate reciprocal for the denom.
    m = jnp.max(scores, axis=0, keepdims=True)                           # (1, TB)
    ex = jnp.exp(scores - m)                                             # (P, TB)
    attn = ex * pl.reciprocal(jnp.sum(ex, axis=0, keepdims=True), approx=True)

    # TODO(synk): dropout(p=dropouts[0]) on attn and dropout(p=dropouts[1]) on the
    #             attended output are treated as identity (inference semantics).

    # Pass 2: attention-weighted sum of interactions. ip is recomputed (one VPU
    # multiply per pair) instead of kept live, so the working set stays O(F*E*TB).
    acc = None
    for p, (i, j) in enumerate(pairs):
        term = attn[p:p + 1] * (emb[i] * emb[j])                          # (E, TB)
        acc = term if acc is None else acc + term

    afm = jnp.sum(acc * fc_w_ref[...], axis=0, keepdims=True)             # (1, TB)
    out_ref[...] = jax.nn.sigmoid(lin_ref[...] + afm)                     # lane-dense store


def afm_forward(x_idx, params, *, stream_dtype=jnp.bfloat16):
    """x_idx: int32 (B, F) per-field categorical indices. Returns float32 (B,)."""
    offsets = params["offsets"]                                  # (F,) int32
    flat_idx = x_idx + offsets[None, :]                          # (B, F)

    # Embedding-table integer gathers stay as XLA glue.
    # TODO(synk): scalar-prefetch flat_idx and DMA-gather embedding rows in-kernel.
    emb = params["embed_table"][flat_idx]                        # (B, F, E)
    linw = params["lin_table"][flat_idx][..., 0]                 # (B, F)

    B, F, E = emb.shape
    A = params["attn_w"].shape[1]
    pairs = tuple((i, j) for i in range(F - 1) for j in range(i + 1, F))
    P = len(pairs)

    # FeaturesLinear pre-summed to a lane-dense (B,) vector; fold in both scalar biases
    # (lin_bias and fc_b; the projection bias cancels in the softmax and is dropped).
    lin = (jnp.sum(linw, axis=1)
           + params["lin_bias"][0, 0] + params["fc_b"][0, 0]).astype(jnp.float32)

    itemsize = jnp.dtype(stream_dtype).itemsize
    TB, vmem_limit = _choose_batch_tile(B, F, P, E, A, itemsize)
    B_pad = _round_up(B, TB)
    nb = B_pad // TB
    pad = B_pad - B

    # Batch-on-lanes layout: (F, E, B_pad) with the batch tiled along the 128-lane axis;
    # the dominant streamed tensor is cast to bf16 to halve its HBM traffic.
    emb_t = jnp.transpose(emb, (1, 2, 0)).astype(stream_dtype)   # (F, E, B)
    if pad:
        emb_t = jnp.pad(emb_t, ((0, 0), (0, 0), (0, pad)))
        lin = jnp.pad(lin, ((0, pad),))
    lin2 = lin.reshape(nb, TB)

    attn_wt = params["attn_w"].T.astype(jnp.float32)             # (A, E)
    attn_b_col = params["attn_b"].reshape(A, 1).astype(jnp.float32)
    proj_w_col = params["proj_w"].reshape(A, 1).astype(jnp.float32)
    fc_w_col = params["fc_w"].reshape(E, 1).astype(jnp.float32)

    def const(shape):
        n = len(shape)
        return pl.BlockSpec(shape, lambda b: (0,) * n)

    out = pl.pallas_call(
        functools.partial(afm_kernel, pairs=pairs),
        out_shape=jax.ShapeDtypeStruct((nb, TB), jnp.float32),
        grid=(nb,),
        in_specs=[
            pl.BlockSpec((F, E, TB), lambda b: (0, 0, b)),       # emb tile (batch on lanes)
            pl.BlockSpec((1, TB), lambda b: (b, 0)),             # linear-term tile
            const((A, E)),                                       # attention W^T
            const((A, 1)),                                       # attention bias
            const((A, 1)),                                       # projection weight
            const((E, 1)),                                       # fc weight
        ],
        out_specs=pl.BlockSpec((1, TB), lambda b: (b, 0)),
        compiler_params=pltpu.CompilerParams(
            dimension_semantics=("parallel",),   # megacore: split batch tiles on v7x
            vmem_limit_bytes=vmem_limit,
        ),
    )(emb_t, lin2, attn_wt, attn_b_col, proj_w_col, fc_w_col)

    return out.reshape(B_pad)[:B]                                # (B,) == sigmoid(x.squeeze(1))


def afm_reference(x_idx, params):
    """Pure-JAX f32 reference of the same forward pass (dropout = identity)."""
    offsets = params["offsets"]
    flat_idx = x_idx + offsets[None, :]
    emb = params["embed_table"][flat_idx]                        # (B, F, E)
    linw = params["lin_table"][flat_idx][..., 0]                 # (B, F)
    B, F, E = emb.shape
    row, col = [], []
    for i in range(F - 1):
        for j in range(i + 1, F):
            row.append(i)
            col.append(j)
    ip = emb[:, row, :] * emb[:, col, :]                         # (B, P, E)
    h = jax.nn.relu(ip @ params["attn_w"] + params["attn_b"][0])
    scores = h @ params["proj_w"] + params["proj_b"][0]          # (B, P, 1)
    attn = jax.nn.softmax(scores, axis=1)
    attn_out = jnp.sum(attn * ip, axis=1)                        # (B, E)
    afm = attn_out @ params["fc_w"] + params["fc_b"][0]          # (B, 1)
    lin = jnp.sum(linw, axis=1, keepdims=True) + params["lin_bias"][0]
    return jax.nn.sigmoid((lin + afm)[:, 0])


def make_params(field_dims, embed_dim, attn_size, key):
    total = int(np.sum(field_dims))
    ks = jax.random.split(key, 8)
    scale = 0.1
    return {
        "offsets": jnp.asarray(np.concatenate(([0], np.cumsum(field_dims)[:-1])),
                               dtype=jnp.int32),
        "embed_table": scale * jax.random.normal(ks[0], (total, embed_dim), jnp.float32),
        "lin_table": scale * jax.random.normal(ks[1], (total, 1), jnp.float32),
        "lin_bias": scale * jax.random.normal(ks[2], (1, 1), jnp.float32),
        "attn_w": scale * jax.random.normal(ks[3], (embed_dim, attn_size), jnp.float32),
        "attn_b": scale * jax.random.normal(ks[4], (1, attn_size), jnp.float32),
        "proj_w": scale * jax.random.normal(ks[5], (attn_size, 1), jnp.float32),
        "proj_b": scale * jax.random.normal(ks[6], (1, 1), jnp.float32),
        "fc_w": scale * jax.random.normal(ks[7], (embed_dim, 1), jnp.float32),
        "fc_b": jnp.zeros((1, 1), jnp.float32),
    }


if __name__ == "__main__":
    # Small, forward-consistent shapes: batch=2, 4 fields, embed_dim=16, attn_size=32.
    field_dims = (5, 7, 11, 13)
    embed_dim, attn_size = 16, 32
    batch = 2

    key = jax.random.PRNGKey(0)
    pkey, xkey = jax.random.split(key)
    params = make_params(field_dims, embed_dim, attn_size, pkey)

    # x: Long tensor of size (batch_size, num_fields), each column in [0, field_dim_i)
    cols = []
    for i, d in enumerate(field_dims):
        cols.append(jax.random.randint(jax.random.fold_in(xkey, i), (batch,), 0, d))
    x = jnp.stack(cols, axis=1).astype(jnp.int32)                # (2, 4)

    out = jax.jit(afm_forward)(x, params)
    out = jax.block_until_ready(out)

    ref = afm_reference(x, params)
    assert out.shape == (batch,)
    # Tolerance covers the bf16-streamed embeddings and the EUP approximate reciprocal
    # in the softmax; observed error for these magnitudes is well below 1e-3.
    np.testing.assert_allclose(np.asarray(out), np.asarray(ref), rtol=2e-3, atol=2e-3)

    print("KERNEL_OK")
</pallas_src>

<mosaic_0001>
module attributes {stable_mosaic.version = 11 : i64} {
  func.func @afm_kernel(%arg0: i32, %arg1: memref<4x16x128xbf16, #tpu.memory_space<vmem>>, %arg2: memref<1x128xf32, #tpu.memory_space<vmem>>, %arg3: memref<32x16xf32, #tpu.memory_space<vmem>>, %arg4: memref<32x1xf32, #tpu.memory_space<vmem>>, %arg5: memref<32x1xf32, #tpu.memory_space<vmem>>, %arg6: memref<16x1xf32, #tpu.memory_space<vmem>>, %arg7: memref<1x128xf32, #tpu.memory_space<vmem>>) attributes {dimension_semantics = [#tpu.dimension_semantics<parallel>], iteration_bounds = array<i64: 1>, scalar_prefetch = 0 : i64, scratch_operands = 0 : i64, tpu.core_type = #tpu.core_type<tc>, window_params = [{transform_indices = @transform_0, window_bounds = array<i64: 4, 16, 128>}, {transform_indices = @transform_1, window_bounds = array<i64: 1, 128>}, {pipeline_mode = #tpu.pipeline_mode<synchronous>, transform_indices = @transform_2, window_bounds = array<i64: 32, 16>}, {pipeline_mode = #tpu.pipeline_mode<synchronous>, transform_indices = @transform_3, window_bounds = array<i64: 32, 1>}, {pipeline_mode = #tpu.pipeline_mode<synchronous>, transform_indices = @transform_4, window_bounds = array<i64: 32, 1>}, {pipeline_mode = #tpu.pipeline_mode<synchronous>, transform_indices = @transform_5, window_bounds = array<i64: 16, 1>}, {transform_indices = @transform_6, window_bounds = array<i64: 1, 128>}]} {
    %c0 = arith.constant 0 : index
    %c0_0 = arith.constant 0 : index
    %c0_1 = arith.constant 0 : index
    %0 = vector.load %arg1[%c0, %c0_0, %c0_1] : memref<4x16x128xbf16, #tpu.memory_space<vmem>>, vector<1x16x128xbf16>
    %1 = vector.shape_cast %0 : vector<1x16x128xbf16> to vector<16x128xbf16>
    %2 = arith.extf %1 : vector<16x128xbf16> to vector<16x128xf32>
    %c1 = arith.constant 1 : index
    %c0_2 = arith.constant 0 : index
    %c0_3 = arith.constant 0 : index
    %3 = vector.load %arg1[%c1, %c0_2, %c0_3] : memref<4x16x128xbf16, #tpu.memory_space<vmem>>, vector<1x16x128xbf16>
    %4 = vector.shape_cast %3 : vector<1x16x128xbf16> to vector<16x128xbf16>
    %5 = arith.extf %4 : vector<16x128xbf16> to vector<16x128xf32>
    %c2 = arith.constant 2 : index
    %c0_4 = arith.constant 0 : index
    %c0_5 = arith.constant 0 : index
    %6 = vector.load %arg1[%c2, %c0_4, %c0_5] : memref<4x16x128xbf16, #tpu.memory_space<vmem>>, vector<1x16x128xbf16>
    %7 = vector.shape_cast %6 : vector<1x16x128xbf16> to vector<16x128xbf16>
    %8 = arith.extf %7 : vector<16x128xbf16> to vector<16x128xf32>
    %c3 = arith.constant 3 : index
    %c0_6 = arith.constant 0 : index
    %c0_7 = arith.constant 0 : index
    %9 = vector.load %arg1[%c3, %c0_6, %c0_7] : memref<4x16x128xbf16, #tpu.memory_space<vmem>>, vector<1x16x128xbf16>
    %10 = vector.shape_cast %9 : vector<1x16x128xbf16> to vector<16x128xbf16>
    %11 = arith.extf %10 : vector<16x128xbf16> to vector<16x128xf32>
    %c0_8 = arith.constant 0 : index
    %c0_9 = arith.constant 0 : index
    %12 = vector.load %arg3[%c0_8, %c0_9] : memref<32x16xf32, #tpu.memory_space<vmem>>, vector<32x16xf32>
    %c0_10 = arith.constant 0 : index
    %c0_11 = arith.constant 0 : index
    %13 = vector.load %arg4[%c0_10, %c0_11] : memref<32x1xf32, #tpu.memory_space<vmem>>, vector<32x1xf32>
    %c0_12 = arith.constant 0 : index
    %c0_13 = arith.constant 0 : index
    %14 = vector.load %arg5[%c0_12, %c0_13] : memref<32x1xf32, #tpu.memory_space<vmem>>, vector<32x1xf32>
    %15 = arith.mulf %2, %5 : vector<16x128xf32>
    %cst = arith.constant dense<0.000000e+00> : vector<32x128xf32>
    %16 = tpu.matmul %12, %15, %cst {dimension_numbers = #tpu.dot_dimension_numbers<[1], [0], [0], [1], [0, 0, 1, 1], [], []>} : vector<32x16xf32>, vector<16x128xf32>, vector<32x128xf32> -> vector<32x128xf32>
    %17 = vector.broadcast %13 : vector<32x1xf32> to vector<32x128xf32>
    %18 = arith.addf %16, %17 : vector<32x128xf32>
    %cst_14 = arith.constant 0.000000e+00 : f32
    %19 = vector.broadcast %cst_14 : f32 to vector<32x128xf32>
    %20 = arith.maximumf %18, %19 : vector<32x128xf32>
    %21 = vector.broadcast %14 : vector<32x1xf32> to vector<32x128xf32>
    %22 = arith.mulf %20, %21 : vector<32x128xf32>
    %cst_15 = arith.constant dense<0.000000e+00> : vector<128xf32>
    %23 = vector.multi_reduction <add>, %22, %cst_15 [0] : vector<32x128xf32> to vector<128xf32>
    %24 = vector.shape_cast %23 : vector<128xf32> to vector<1x128xf32>
    %25 = arith.mulf %2, %8 : vector<16x128xf32>
    %cst_16 = arith.constant dense<0.000000e+00> : vector<32x128xf32>
    %26 = tpu.matmul %12, %25, %cst_16 {dimension_numbers = #tpu.dot_dimension_numbers<[1], [0], [0], [1], [0, 0, 1, 1], [], []>} : vector<32x16xf32>, vector<16x128xf32>, vector<32x128xf32> -> vector<32x128xf32>
    %27 = vector.broadcast %13 : vector<32x1xf32> to vector<32x128xf32>
    %28 = arith.addf %26, %27 : vector<32x128xf32>
    %cst_17 = arith.constant 0.000000e+00 : f32
    %29 = vector.broadcast %cst_17 : f32 to vector<32x128xf32>
    %30 = arith.maximumf %28, %29 : vector<32x128xf32>
    %31 = vector.broadcast %14 : vector<32x1xf32> to vector<32x128xf32>
    %32 = arith.mulf %30, %31 : vector<32x128xf32>
    %cst_18 = arith.constant dense<0.000000e+00> : vector<128xf32>
    %33 = vector.multi_reduction <add>, %32, %cst_18 [0] : vector<32x128xf32> to vector<128xf32>
    %34 = vector.shape_cast %33 : vector<128xf32> to vector<1x128xf32>
    %35 = arith.mulf %2, %11 : vector<16x128xf32>
    %cst_19 = arith.constant dense<0.000000e+00> : vector<32x128xf32>
    %36 = tpu.matmul %12, %35, %cst_19 {dimension_numbers = #tpu.dot_dimension_numbers<[1], [0], [0], [1], [0, 0, 1, 1], [], []>} : vector<32x16xf32>, vector<16x128xf32>, vector<32x128xf32> -> vector<32x128xf32>
    %37 = vector.broadcast %13 : vector<32x1xf32> to vector<32x128xf32>
    %38 = arith.addf %36, %37 : vector<32x128xf32>
    %cst_20 = arith.constant 0.000000e+00 : f32
    %39 = vector.broadcast %cst_20 : f32 to vector<32x128xf32>
    %40 = arith.maximumf %38, %39 : vector<32x128xf32>
    %41 = vector.broadcast %14 : vector<32x1xf32> to vector<32x128xf32>
    %42 = arith.mulf %40, %41 : vector<32x128xf32>
    %cst_21 = arith.constant dense<0.000000e+00> : vector<128xf32>
    %43 = vector.multi_reduction <add>, %42, %cst_21 [0] : vector<32x128xf32> to vector<128xf32>
    %44 = vector.shape_cast %43 : vector<128xf32> to vector<1x128xf32>
    %45 = arith.mulf %5, %8 : vector<16x128xf32>
    %cst_22 = arith.constant dense<0.000000e+00> : vector<32x128xf32>
    %46 = tpu.matmul %12, %45, %cst_22 {dimension_numbers = #tpu.dot_dimension_numbers<[1], [0], [0], [1], [0, 0, 1, 1], [], []>} : vector<32x16xf32>, vector<16x128xf32>, vector<32x128xf32> -> vector<32x128xf32>
    %47 = vector.broadcast %13 : vector<32x1xf32> to vector<32x128xf32>
    %48 = arith.addf %46, %47 : vector<32x128xf32>
    %cst_23 = arith.constant 0.000000e+00 : f32
    %49 = vector.broadcast %cst_23 : f32 to vector<32x128xf32>
    %50 = arith.maximumf %48, %49 : vector<32x128xf32>
    %51 = vector.broadcast %14 : vector<32x1xf32> to vector<32x128xf32>
    %52 = arith.mulf %50, %51 : vector<32x128xf32>
    %cst_24 = arith.constant dense<0.000000e+00> : vector<128xf32>
    %53 = vector.multi_reduction <add>, %52, %cst_24 [0] : vector<32x128xf32> to vector<128xf32>
    %54 = vector.shape_cast %53 : vector<128xf32> to vector<1x128xf32>
    %55 = arith.mulf %5, %11 : vector<16x128xf32>
    %cst_25 = arith.constant dense<0.000000e+00> : vector<32x128xf32>
    %56 = tpu.matmul %12, %55, %cst_25 {dimension_numbers = #tpu.dot_dimension_numbers<[1], [0], [0], [1], [0, 0, 1, 1], [], []>} : vector<32x16xf32>, vector<16x128xf32>, vector<32x128xf32> -> vector<32x128xf32>
    %57 = vector.broadcast %13 : vector<32x1xf32> to vector<32x128xf32>
    %58 = arith.addf %56, %57 : vector<32x128xf32>
    %cst_26 = arith.constant 0.000000e+00 : f32
    %59 = vector.broadcast %cst_26 : f32 to vector<32x128xf32>
    %60 = arith.maximumf %58, %59 : vector<32x128xf32>
    %61 = vector.broadcast %14 : vector<32x1xf32> to vector<32x128xf32>
    %62 = arith.mulf %60, %61 : vector<32x128xf32>
    %cst_27 = arith.constant dense<0.000000e+00> : vector<128xf32>
    %63 = vector.multi_reduction <add>, %62, %cst_27 [0] : vector<32x128xf32> to vector<128xf32>
    %64 = vector.shape_cast %63 : vector<128xf32> to vector<1x128xf32>
    %65 = arith.mulf %8, %11 : vector<16x128xf32>
    %cst_28 = arith.constant dense<0.000000e+00> : vector<32x128xf32>
    %66 = tpu.matmul %12, %65, %cst_28 {dimension_numbers = #tpu.dot_dimension_numbers<[1], [0], [0], [1], [0, 0, 1, 1], [], []>} : vector<32x16xf32>, vector<16x128xf32>, vector<32x128xf32> -> vector<32x128xf32>
    %67 = vector.broadcast %13 : vector<32x1xf32> to vector<32x128xf32>
    %68 = arith.addf %66, %67 : vector<32x128xf32>
    %cst_29 = arith.constant 0.000000e+00 : f32
    %69 = vector.broadcast %cst_29 : f32 to vector<32x128xf32>
    %70 = arith.maximumf %68, %69 : vector<32x128xf32>
    %71 = vector.broadcast %14 : vector<32x1xf32> to vector<32x128xf32>
    %72 = arith.mulf %70, %71 : vector<32x128xf32>
    %cst_30 = arith.constant dense<0.000000e+00> : vector<128xf32>
    %73 = vector.multi_reduction <add>, %72, %cst_30 [0] : vector<32x128xf32> to vector<128xf32>
    %74 = vector.shape_cast %73 : vector<128xf32> to vector<1x128xf32>
    %75 = tpu.concatenate %24, %34, %44, %54, %64, %74 in 0 : vector<1x128xf32>, vector<1x128xf32>, vector<1x128xf32>, vector<1x128xf32>, vector<1x128xf32>, vector<1x128xf32> -> vector<6x128xf32>
    %cst_31 = arith.constant dense<0xFF800000> : vector<128xf32>
    %76 = vector.multi_reduction <maximumf>, %75, %cst_31 [0] : vector<6x128xf32> to vector<128xf32>
    %77 = vector.shape_cast %76 : vector<128xf32> to vector<1x128xf32>
    %78 = vector.broadcast %77 : vector<1x128xf32> to vector<6x128xf32>
    %79 = arith.subf %75, %78 : vector<6x128xf32>
    %80 = math.exp %79 : vector<6x128xf32>
    %cst_32 = arith.constant dense<0.000000e+00> : vector<128xf32>
    %81 = vector.multi_reduction <add>, %80, %cst_32 [0] : vector<6x128xf32> to vector<128xf32>
    %82 = vector.shape_cast %81 : vector<128xf32> to vector<1x128xf32>
    %83 = tpu.reciprocal %82 {approx = true} : vector<1x128xf32> -> vector<1x128xf32>
    %84 = vector.broadcast %83 : vector<1x128xf32> to vector<6x128xf32>
    %85 = arith.mulf %80, %84 : vector<6x128xf32>
    %86 = vector.extract_strided_slice %85 {offsets = [0, 0], sizes = [1, 128], strides = [1, 1]} : vector<6x128xf32> to vector<1x128xf32>
    %87 = arith.mulf %2, %5 : vector<16x128xf32>
    %88 = vector.broadcast %86 : vector<1x128xf32> to vector<16x128xf32>
    %89 = arith.mulf %88, %87 : vector<16x128xf32>
    %90 = vector.extract_strided_slice %85 {offsets = [1, 0], sizes = [1, 128], strides = [1, 1]} : vector<6x128xf32> to vector<1x128xf32>
    %91 = arith.mulf %2, %8 : vector<16x128xf32>
    %92 = vector.broadcast %90 : vector<1x128xf32> to vector<16x128xf32>
    %93 = arith.mulf %92, %91 : vector<16x128xf32>
    %94 = arith.addf %89, %93 : vector<16x128xf32>
    %95 = vector.extract_strided_slice %85 {offsets = [2, 0], sizes = [1, 128], strides = [1, 1]} : vector<6x128xf32> to vector<1x128xf32>
    %96 = arith.mulf %2, %11 : vector<16x128xf32>
    %97 = vector.broadcast %95 : vector<1x128xf32> to vector<16x128xf32>
    %98 = arith.mulf %97, %96 : vector<16x128xf32>
    %99 = arith.addf %94, %98 : vector<16x128xf32>
    %100 = vector.extract_strided_slice %85 {offsets = [3, 0], sizes = [1, 128], strides = [1, 1]} : vector<6x128xf32> to vector<1x128xf32>
    %101 = arith.mulf %5, %8 : vector<16x128xf32>
    %102 = vector.broadcast %100 : vector<1x128xf32> to vector<16x128xf32>
    %103 = arith.mulf %102, %101 : vector<16x128xf32>
    %104 = arith.addf %99, %103 : vector<16x128xf32>
    %105 = vector.extract_strided_slice %85 {offsets = [4, 0], sizes = [1, 128], strides = [1, 1]} : vector<6x128xf32> to vector<1x128xf32>
    %106 = arith.mulf %5, %11 : vector<16x128xf32>
    %107 = vector.broadcast %105 : vector<1x128xf32> to vector<16x128xf32>
    %108 = arith.mulf %107, %106 : vector<16x128xf32>
    %109 = arith.addf %104, %108 : vector<16x128xf32>
    %110 = vector.extract_strided_slice %85 {offsets = [5, 0], sizes = [1, 128], strides = [1, 1]} : vector<6x128xf32> to vector<1x128xf32>
    %111 = arith.mulf %8, %11 : vector<16x128xf32>
    %112 = vector.broadcast %110 : vector<1x128xf32> to vector<16x128xf32>
    %113 = arith.mulf %112, %111 : vector<16x128xf32>
    %114 = arith.addf %109, %113 : vector<16x128xf32>
    %c0_33 = arith.constant 0 : index
    %c0_34 = arith.constant 0 : index
    %115 = vector.load %arg6[%c0_33, %c0_34] : memref<16x1xf32, #tpu.memory_space<vmem>>, vector<16x1xf32>
    %116 = vector.broadcast %115 : vector<16x1xf32> to vector<16x128xf32>
    %117 = arith.mulf %114, %116 : vector<16x128xf32>
    %cst_35 = arith.constant dense<0.000000e+00> : vector<128xf32>
    %118 = vector.multi_reduction <add>, %117, %cst_35 [0] : vector<16x128xf32> to vector<128xf32>
    %119 = vector.shape_cast %118 : vector<128xf32> to vector<1x128xf32>
    %c0_36 = arith.constant 0 : index
    %c0_37 = arith.constant 0 : index
    %120 = vector.load %arg2[%c0_36, %c0_37] : memref<1x128xf32, #tpu.memory_space<vmem>>, vector<1x128xf32>
    %121 = arith.addf %120, %119 : vector<1x128xf32>
    %122 = arith.negf %121 : vector<1x128xf32>
    %123 = math.exp %122 : vector<1x128xf32>
    %cst_38 = arith.constant 1.000000e+00 : f32
    %124 = vector.broadcast %cst_38 : f32 to vector<1x128xf32>
    %125 = arith.addf %124, %123 : vector<1x128xf32>
    %126 = arith.divf %124, %125 : vector<1x128xf32>
    %c0_39 = arith.constant 0 : index
    %c0_40 = arith.constant 0 : index
    %127 = vector.load %arg7[%c0_39, %c0_40] : memref<1x128xf32, #tpu.memory_space<vmem>>, vector<1x128xf32>
    tpu.vector_store %arg7[%c0_39, %c0_40], %126 {strides = array<i32>} : memref<1x128xf32, #tpu.memory_space<vmem>>, vector<1x128xf32>,
    return
  }
  func.func @transform_0(%arg0: i32) -> (i32, i32, i32) {
    %c0_i32 = arith.constant 0 : i32
    %c0_i32_0 = arith.constant 0 : i32
    %c0_i32_1 = arith.constant 0 : i32
    return %c0_i32, %c0_i32_0, %arg0 : i32, i32, i32
  }
  func.func @transform_1(%arg0: i32) -> (i32, i32) {
    %c0_i32 = arith.constant 0 : i32
    %c0_i32_0 = arith.constant 0 : i32
    return %arg0, %c0_i32 : i32, i32
  }
  func.func @transform_2(%arg0: i32) -> (i32, i32) {
    %c0_i32 = arith.constant 0 : i32
    %c0_i32_0 = arith.constant 0 : i32
    %c0_i32_1 = arith.constant 0 : i32
    return %c0_i32, %c0_i32_0 : i32, i32
  }
  func.func @transform_3(%arg0: i32) -> (i32, i32) {
    %c0_i32 = arith.constant 0 : i32
    %c0_i32_0 = arith.constant 0 : i32
    %c0_i32_1 = arith.constant 0 : i32
    return %c0_i32, %c0_i32_0 : i32, i32
  }
  func.func @transform_4(%arg0: i32) -> (i32, i32) {
    %c0_i32 = arith.constant 0 : i32
    %c0_i32_0 = arith.constant 0 : i32
    %c0_i32_1 = arith.constant 0 : i32
    return %c0_i32, %c0_i32_0 : i32, i32
  }
  func.func @transform_5(%arg0: i32) -> (i32, i32) {
    %c0_i32 = arith.constant 0 : i32
    %c0_i32_0 = arith.constant 0 : i32
    %c0_i32_1 = arith.constant 0 : i32
    return %c0_i32, %c0_i32_0 : i32, i32
  }
  func.func @transform_6(%arg0: i32) -> (i32, i32) {
    %c0_i32 = arith.constant 0 : i32
    %c0_i32_0 = arith.constant 0 : i32
    return %arg0, %c0_i32 : i32, i32
  }
}

</mosaic_0001>

<bundles_post_ra>
// kernel: afm_forward.1
= control target key start
LH: loop header
LB: loop body
LE: loop exit
PB: predicated region body
PF: predicated region fallthrough
CT: control target
= control target key end

     0   :  { %vm76_vm0 = vcmask 130048   ;;  %v1022_v3 = vmov 0   ;;  %vm731_vm1 = vcmask 1040384   ;;  %vm733_vm2 = vcmask 1041408   ;;  %s1263_s0 = inlined_call_operand.vmem [shape: bf16[4,16,128], index: 0, kind: input, shape index: {}]   ;;  %s1264_s2 = inlined_call_operand.vmem [shape: f32[32,16], index: 2, kind: input, shape index: {}]   ;;  %s1265_s3 = inlined_call_operand.vmem [shape: f32[32,1], index: 3, kind: input, shape index: {}]   ;;  %s1266_s4 = inlined_call_operand.vmem [shape: f32[32,1], index: 4, kind: input, shape index: {}]   ;;  %s1267_s5 = inlined_call_operand.vmem [shape: f32[16,1], index: 5, kind: input, shape index: {}]   ;;  %s1268_s1 = inlined_call_operand.vmem [shape: f32[1,128], index: 1, kind: input, shape index: {}]   ;;  %s1269_s6 = inlined_call_operand.vmem [shape: f32[1,128], index: 6, kind: output, shape index: {}]  }
   0x1   :  { %v873_v0 = vld [vmem:[%s1263_s0] sm:$0xff]   ;;  %v888_v1 = vld [vmem:[%s1263_s0 + $0x8] sm:$0xff]   ;;  %v889_v2 = vld [vmem:[%s1263_s0 + $0x10] sm:$0xff]   ;;  %1012 = vset.pattern.permute.xlu0 %v1022_v3  ;;  %1013 = vset.pattern.permute.xlu1 %v1022_v3  ;;  %vm735_vm3 = vcmask 1042432   ;;  %vm737_vm4 = vcmask 1043456   ;;  %vm739_vm5 = vcmask 1044480  }
   0x2   :  { %v874_v4 = vunpack.c.l.bf16 %v873_v0  ;;  %v875_v5 = vunpack.c.h.bf16 %v873_v0  ;;  %v878_v6 = vunpack.c.l.bf16 %v888_v1  ;;  %v879_v7 = vunpack.c.h.bf16 %v888_v1  ;;  %v1070_v8 = vld [vmem:[%s1264_s2] sm:$0xff]  ;;  %v890_v9 = vld [vmem:[%s1263_s0 + $0x18] sm:$0xff]   ;;  %v48_v17 = vld [vmem:[%s1265_s3 + $0x10] sm:$0xff] }
   0x3   :  { %v882_v10 = vunpack.c.l.bf16 %v889_v2  ;;  %v883_v11 = vunpack.c.h.bf16 %v889_v2  ;;  %931 = vmatprep.mubr.msk.f32.mxu0 %vm76_vm0, %v1070_v8  ;;  %941 = vmatprep.mubr.msk.f32.mxu1 %vm76_vm0, %v1070_v8  ;;  %v886_v12 = vunpack.c.l.bf16 %v890_v9  ;;  %v887_v13 = vunpack.c.h.bf16 %v890_v9  ;;  %v46_v14 = vld [vmem:[%s1265_s3] sm:$0xff]  ;;  %v47_v22 = vld [vmem:[%s1265_s3 + $0x8] sm:$0xff]  ;;  %v49_v33 = vld [vmem:[%s1265_s3 + $0x18] sm:$0xff] }
   0x4   :  { %v1082_v15 = vmul.f32 %v878_v6, %v874_v4  ;;  %v1084_v16 = vmul.f32 %v879_v7, %v875_v5  ;;  %58 = vperm.xlu0 %1012, %v46_v14   ;;  %68 = vperm.xlu1 %1013, %v48_v17   ;;  %v43_v34 = vld [vmem:[%s1264_s2 + $0x8] sm:$0xff]  ;;  %v50_v35 = vld [vmem:[%s1266_s4] sm:$0xff]  ;;  %v44_v36 = vld [vmem:[%s1264_s2 + $0x10] sm:$0xff]  ;;  %vm741_vm6 = vcmask 1045504  }
   0x5   :  { %v1089_v18 = vmul.f32 %v882_v10, %v874_v4  ;;  %v1091_v19 = vmul.f32 %v883_v11, %v875_v5  ;;  %v1093_v20 = vmul.f32 %v886_v12, %v874_v4  ;;  %v1095_v21 = vmul.f32 %v887_v13, %v875_v5  ;;  %v45_v39 = vld [vmem:[%s1264_s2 + $0x18] sm:$0xff]  ;;  %v51_v40 = vld [vmem:[%s1266_s4 + $0x8] sm:$0xff]  ;;  %v52_v41 = vld [vmem:[%s1266_s4 + $0x10] sm:$0xff] }
   0x6   :  { %v987_v23 = vpack.c.bf16 %v1084_v16, %v1082_v15  ;;  %v1102_v24 = vmul.f32 %v882_v10, %v878_v6  ;;  %v1104_v25 = vmul.f32 %v883_v11, %v879_v7  ;;  %v1110_v28 = vmul.f32 %v886_v12, %v878_v6  ;;  %v53_v42 = vld [vmem:[%s1266_s4 + $0x18] sm:$0xff]  ;;  %v807_v43 = vld [vmem:[%s1267_s5] sm:$0xff]  ;;  %v808_v44 = vld [vmem:[%s1267_s5 + $0x8] sm:$0xff] }
   0x7   :  { %v991_v26 = vpack.c.bf16 %v1091_v19, %v1089_v18  ;;  %v995_v27 = vpack.c.bf16 %v1095_v21, %v1093_v20  ;;  %v1112_v29 = vmul.f32 %v887_v13, %v879_v7  ;;  %v1116_v31 = vmul.f32 %v886_v12, %v882_v10 }
   0x8   :  { %988 = vmatprep.subr.bf16.mxu0 %v987_v23  ;;  %v999_v30 = vpack.c.bf16 %v1104_v25, %v1102_v24  ;;  %v1118_v32 = vmul.f32 %v887_v13, %v883_v11  ;;  %63 = vperm.xlu0 %1012, %v47_v22  }
   0x9   :  { %992 = vmatprep.subr.bf16.mxu1 %v991_v26  ;;  %990 = vmatpush3.bf16.msra.mxu0 %v987_v23  ;;  %v1003_v37 = vpack.c.bf16 %v1112_v29, %v1110_v28 }
   0xa   :  { %994 = vmatpush3.bf16.msra.mxu1 %v991_v26  ;;  %996 = vmatprep.subr.bf16.mxu0 %v995_v27  ;;  %v1007_v38 = vpack.c.bf16 %v1118_v32, %v1116_v31 }
   0xb   :  { %1000 = vmatprep.subr.bf16.mxu1 %v999_v30  ;;  %73 = vperm.xlu1 %1013, %v49_v33  }
   0xc   :  { %932 = vmatmul.mubr.msk.f32.vlgmr.msra.gmra.mrb[0].mxu0 %vm76_vm0, %v43_v34  ;;  %180 = vperm.xlu0 %1012, %v50_v35  }
   0xd   :  { %942 = vmatmul.mubr.msk.f32.vlgmr.msra.gmra.mrb[0].mxu1 %vm76_vm0, %v43_v34  ;;  %998 = vmatpush3.bf16.msra.mxu0 %v995_v27 }
   0xe   :  { %1002 = vmatpush3.bf16.msra.mxu1 %v999_v30  ;;  %934 = vmatprep.mubr.msk.f32.mxu0 %vm76_vm0, %v44_v36 }
   0xf   :  { %944 = vmatprep.mubr.msk.f32.mxu1 %vm76_vm0, %v44_v36  ;;  %1004 = vmatprep.subr.bf16.mxu0 %v1003_v37 }
  0x10   :  { %935 = vmatmul.mubr.msk.f32.gmra.mrb[2].mxu0 %vm76_vm0, %v45_v39  ;;  %1008 = vmatprep.subr.bf16.mxu1 %v1007_v38 }
  0x11   :  { %945 = vmatmul.mubr.msk.f32.gmra.mrb[2].mxu1 %vm76_vm0, %v45_v39  ;;  %951 = vmatprep.mubr.msk.f32.mxu0 %vm76_vm0, %v1070_v8 }
  0x12   :  { %961 = vmatprep.mubr.msk.f32.mxu1 %vm76_vm0, %v1070_v8  ;;  %185 = vperm.xlu1 %1013, %v51_v40  }
  0x13   :  { %190 = vperm.xlu0 %1012, %v52_v41  }
  0x14   :  { %952 = vmatmul.mubr.msk.f32.vlgmr.msra.gmra.mrb[4].mxu0 %vm76_vm0, %v43_v34 }
  0x15   :  { %962 = vmatmul.mubr.msk.f32.vlgmr.msra.gmra.mrb[4].mxu1 %vm76_vm0, %v43_v34  ;;  %1006 = vmatpush3.bf16.msra.mxu0 %v1003_v37 }
  0x16   :  { %1010 = vmatpush3.bf16.msra.mxu1 %v1007_v38  ;;  %954 = vmatprep.mubr.msk.f32.mxu0 %vm76_vm0, %v44_v36 }
  0x17   :  { %964 = vmatprep.mubr.msk.f32.mxu1 %vm76_vm0, %v44_v36  ;;  %195 = vperm.xlu1 %1013, %v53_v42  }
  0x18   :  { %955 = vmatmul.mubr.msk.f32.gmra.mrb[6].mxu0 %vm76_vm0, %v45_v39  ;;  %811 = vperm.xlu0 %1012, %v807_v43  }
  0x19   :  { %965 = vmatmul.mubr.msk.f32.gmra.mrb[6].mxu1 %vm76_vm0, %v45_v39  ;;  %971 = vmatprep.mubr.msk.f32.mxu0 %vm76_vm0, %v1070_v8 }
  0x1a   :  { %981 = vmatprep.mubr.msk.f32.mxu1 %vm76_vm0, %v1070_v8 }
  0x1b   :  { %816 = vperm.xlu1 %1013, %v808_v44  }
  0x1c   :  { %972 = vmatmul.mubr.msk.f32.vlgmr.msra.gmra.mrb[8].mxu0 %vm76_vm0, %v43_v34 }
  0x1d   :  { %982 = vmatmul.mubr.msk.f32.vlgmr.msra.gmra.mrb[8].mxu1 %vm76_vm0, %v43_v34  ;;  %974 = vmatprep.mubr.msk.f32.mxu0 %vm76_vm0, %v44_v36 }
  0x1e   :  { %984 = vmatprep.mubr.msk.f32.mxu1 %vm76_vm0, %v44_v36 }
  0x20   :  { %975 = vmatmul.mubr.msk.f32.gmra.mrb[10].mxu0 %vm76_vm0, %v45_v39 }
  0x21   :  { %985 = vmatmul.mubr.msk.f32.gmra.mrb[10].mxu1 %vm76_vm0, %v45_v39 }
  0x83   :  { %v1180_v45 = vpop.permute.xlu0 %58  ;;  %v1182_v46 = vpop.permute.xlu1 %68 }
  0x87   :  { %v1184_v47 = vpop.permute.xlu0 %63 }
  0x8a   :  { %v1186_v48 = vpop.permute.xlu1 %73 }
  0x8b   :  { %v1188_v50 = vpop.permute.xlu0 %180 }
  0x91   :  { %v1193_v57 = vpop.permute.xlu1 %185 }
  0x92   :  { %v1204_v12 = vpop.permute.xlu0 %190 }
  0x96   :  { %v1206_v23 = vpop.permute.xlu1 %195 }
  0xdf   :  { %v933_v49 = vpop.f32.mrb[0].mxu0 }
  0xe0   :  { %v161_v51 = vadd.f32 %v933_v49, %v1184_v47  ;;  %v155_v52 = vpop.f32.mrb[1].mxu0  ;;  %v943_v53 = vpop.f32.mrb[0].mxu1 }
  0xe1   :  { %v156_v54 = vadd.f32 %v155_v52, %v1180_v45  ;;  %v285_v55 = vadd.f32 %v943_v53, %v1184_v47  ;;  %v279_v56 = vpop.f32.mrb[1].mxu1 }
  0xe2   :  { %v175_v58 = vmax.f32 %v161_v51, 0.0  ;;  %v280_v59 = vadd.f32 %v279_v56, %v1180_v45 }
  0xe3   :  { %v174_v60 = vmax.f32 %v156_v54, 0.0  ;;  %v299_v61 = vmax.f32 %v285_v55, 0.0  ;;  %v936_v62 = vpop.f32.mrb[2].mxu0 }
  0xe4   :  { %v298_v63 = vmax.f32 %v280_v59, 0.0  ;;  %v171_v0 = vadd.f32 %v936_v62, %v1186_v48  ;;  %v946_v1 = vpop.f32.mrb[2].mxu1  ;;  %v199_v2 = vmul.f32 %v1193_v57, %v175_v58  ;;  %v165_v3 = vpop.f32.mrb[3].mxu0 }
  0xe5   :  { %v198_v4 = vmul.f32 %v1188_v50, %v174_v60  ;;  %v295_v5 = vadd.f32 %v946_v1, %v1186_v48  ;;  %v303_v6 = vmul.f32 %v299_v61, %v1193_v57  ;;  %v166_v7 = vadd.f32 %v165_v3, %v1182_v46  ;;  %v289_v8 = vpop.f32.mrb[3].mxu1 }
  0xe6   :  { %v302_v9 = vmul.f32 %v298_v63, %v1188_v50  ;;  %v177_v10 = vmax.f32 %v171_v0, 0.0  ;;  %v290_v11 = vadd.f32 %v289_v8, %v1182_v46 }
  0xe7   :  { %v301_v13 = vmax.f32 %v295_v5, 0.0  ;;  %v202_v14 = vadd.f32 %v199_v2, %v198_v4  ;;  %v176_v17 = vmax.f32 %v166_v7, 0.0  ;;  %v953_v22 = vpop.f32.mrb[4].mxu0 }
  0xe8   :  { %v306_v26 = vadd.f32 %v303_v6, %v302_v9  ;;  %v300_v27 = vmax.f32 %v290_v11, 0.0  ;;  %v389_v30 = vadd.f32 %v953_v22, %v1184_v47  ;;  %v963_v33 = vpop.f32.mrb[4].mxu1  ;;  %v383_v34 = vpop.f32.mrb[5].mxu0  ;;  %v201_v41 = vmul.f32 %v1206_v23, %v177_v10 }
  0xe9   :  { %v200_v35 = vmul.f32 %v1204_v12, %v176_v17  ;;  %v493_v36 = vadd.f32 %v963_v33, %v1184_v47  ;;  %v384_v37 = vadd.f32 %v383_v34, %v1180_v45  ;;  %v487_v38 = vpop.f32.mrb[5].mxu1  ;;  %v305_v49 = vmul.f32 %v301_v13, %v1206_v23 }
  0xea   :  { %v304_v39 = vmul.f32 %v300_v27, %v1204_v12  ;;  %v403_v40 = vmax.f32 %v389_v30, 0.0  ;;  %v488_v42 = vadd.f32 %v487_v38, %v1180_v45 }
  0xeb   :  { %v203_v43 = vadd.f32 %v202_v14, %v200_v35  ;;  %v507_v44 = vmax.f32 %v493_v36, 0.0  ;;  %v402_v51 = vmax.f32 %v384_v37, 0.0  ;;  %v956_v52 = vpop.f32.mrb[6].mxu0 }
  0xec   :  { %v307_v53 = vadd.f32 %v306_v26, %v304_v39  ;;  %v407_v54 = vmul.f32 %v403_v40, %v1193_v57  ;;  %v506_v55 = vmax.f32 %v488_v42, 0.0  ;;  %v399_v56 = vadd.f32 %v956_v52, %v1186_v48  ;;  %v966_v58 = vpop.f32.mrb[6].mxu1  ;;  %v393_v59 = vpop.f32.mrb[7].mxu0 }
  0xed   :  { %v511_v60 = vmul.f32 %v507_v44, %v1193_v57  ;;  %v204_v61 = vadd.f32 %v203_v43, %v201_v41  ;;  %v406_v62 = vmul.f32 %v402_v51, %v1188_v50  ;;  %v503_v63 = vadd.f32 %v966_v58, %v1186_v48  ;;  %v497_v0 = vpop.f32.mrb[7].mxu1 }
  0xee   :  { %v308_v1 = vadd.f32 %v307_v53, %v305_v49  ;;  %v510_v2 = vmul.f32 %v506_v55, %v1188_v50  ;;  %v405_v3 = vmax.f32 %v399_v56, 0.0  ;;  %v394_v4 = vadd.f32 %v393_v59, %v1182_v46 }
  0xef   :  { %v205_v5 = vrot.slane %v204_v61, 4  ;;  %v410_v6 = vadd.f32 %v407_v54, %v406_v62  ;;  %v509_v7 = vmax.f32 %v503_v63, 0.0  ;;  %v498_v8 = vadd.f32 %v497_v0, %v1182_v46  ;;  %v973_v9 = vpop.f32.mrb[8].mxu0 }
  0xf0   :  { %v309_v10 = vrot.slane %v308_v1, 4  ;;  %v514_v11 = vadd.f32 %v511_v60, %v510_v2  ;;  %v409_v13 = vmul.f32 %v405_v3, %v1206_v23  ;;  %v404_v14 = vmax.f32 %v394_v4, 0.0  ;;  %v983_v17 = vpop.f32.mrb[8].mxu1  ;;  %v591_v22 = vpop.f32.mrb[9].mxu0 }
  0xf1   :  { %v206_v26 = vadd.f32 %v205_v5, %v204_v61  ;;  %v513_v27 = vmul.f32 %v509_v7, %v1206_v23  ;;  %v508_v30 = vmax.f32 %v498_v8, 0.0  ;;  %v597_v33 = vadd.f32 %v973_v9, %v1184_v47  ;;  %v695_v34 = vpop.f32.mrb[9].mxu1 }
  0xf2   :  { %v310_v35 = vadd.f32 %v309_v10, %v308_v1  ;;  %v408_v36 = vmul.f32 %v404_v14, %v1204_v12  ;;  %v701_v37 = vadd.f32 %v983_v17, %v1184_v47  ;;  %v592_v38 = vadd.f32 %v591_v22, %v1180_v45 }
  0xf3   :  { %v207_v39 = vrot.slane %v206_v26, 2  ;;  %v512_v40 = vmul.f32 %v508_v30, %v1204_v12  ;;  %v611_v41 = vmax.f32 %v597_v33, 0.0  ;;  %v696_v42 = vadd.f32 %v695_v34, %v1180_v45  ;;  %v976_v43 = vpop.f32.mrb[10].mxu0 }
  0xf4   :  { %v311_v44 = vrot.slane %v310_v35, 2  ;;  %v411_v49 = vadd.f32 %v410_v6, %v408_v36  ;;  %v715_v51 = vmax.f32 %v701_v37, 0.0  ;;  %v610_v52 = vmax.f32 %v592_v38, 0.0  ;;  %v986_v53 = vpop.f32.mrb[10].mxu1  ;;  %v601_v54 = vpop.f32.mrb[11].mxu0 }
  0xf5   :  { %v208_v55 = vadd.f32 %v207_v39, %v206_v26  ;;  %v515_v56 = vadd.f32 %v514_v11, %v512_v40  ;;  %v615_v58 = vmul.f32 %v611_v41, %v1193_v57  ;;  %v714_v47 = vmax.f32 %v696_v42, 0.0  ;;  %v705_v59 = vpop.f32.mrb[11].mxu1 }
  0xf6   :  { %v312_v60 = vadd.f32 %v311_v44, %v310_v35  ;;  %v412_v61 = vadd.f32 %v411_v49, %v409_v13  ;;  %v719_v62 = vmul.f32 %v715_v51, %v1193_v57  ;;  %v614_v63 = vmul.f32 %v610_v52, %v1188_v50 }
  0xf7   :  { %v209_v45 = vrot.slane %v208_v55, 1  ;;  %v516_v0 = vadd.f32 %v515_v56, %v513_v27  ;;  %v718_v1 = vmul.f32 %v714_v47, %v1188_v50  ;;  %v607_v5 = vadd.f32 %v976_v43, %v1186_v48 }
  0xf8   :  { %v313_v2 = vrot.slane %v312_v60, 1  ;;  %v413_v3 = vrot.slane %v412_v61, 4  ;;  %v618_v4 = vadd.f32 %v615_v58, %v614_v63  ;;  %v711_v9 = vadd.f32 %v986_v53, %v1186_v48 }
  0xf9   :  { %v210_v6 = vadd.f32 %v209_v45, %v208_v55  ;;  %v517_v7 = vrot.slane %v516_v0, 4  ;;  %v722_v8 = vadd.f32 %v719_v62, %v718_v1  ;;  %v602_v57 = vadd.f32 %v601_v54, %v1182_v46 }
  0xfa   :  { %v314_v10 = vadd.f32 %v313_v2, %v312_v60  ;;  %v414_v11 = vadd.f32 %v413_v3, %v412_v61  ;;  %v706_v14 = vadd.f32 %v705_v59, %v1182_v46  ;;  %v613_v22 = vmax.f32 %v607_v5, 0.0 }
  0xfb   :  { %v518_v13 = vadd.f32 %v517_v7, %v516_v0  ;;  %v612_v26 = vmax.f32 %v602_v57, 0.0  ;;  %v717_v30 = vmax.f32 %v711_v9, 0.0 }
  0xfc   :  { %v415_v17 = vrot.slane %v414_v11, 2  ;;  %v732_v50 = vsel %vm731_vm1, %v210_v6, %v314_v10  ;;  %v716_v33 = vmax.f32 %v706_v14, 0.0  ;;  %v617_v38 = vmul.f32 %v613_v22, %v1206_v23 }
  0xfd   :  { %v519_v27 = vrot.slane %v518_v13, 2  ;;  %v616_v35 = vmul.f32 %v612_v26, %v1204_v12  ;;  %v721_v40 = vmul.f32 %v717_v30, %v1206_v23  ;;  %v761_v22 = vlaneseq }
  0xfe   :  { %v416_v34 = vadd.f32 %v415_v17, %v414_v11  ;;  %v720_v48 = vmul.f32 %v716_v33, %v1204_v12 }
  0xff   :  { %v520_v36 = vadd.f32 %v519_v27, %v518_v13  ;;  %v619_v39 = vadd.f32 %v618_v4, %v616_v35  ;;  %v762_v26 = vshrl.u32 %v761_v22, 7 }
 0x100   :  { %v417_v37 = vrot.slane %v416_v34, 1  ;;  %v723_v41 = vadd.f32 %v722_v8, %v720_v48 }
 0x101   :  { %v521_v46 = vrot.slane %v520_v36, 1  ;;  %v620_v43 = vadd.f32 %v619_v39, %v617_v38  ;;  %v763_v27 = vsub.s32 0, %v762_v26  ;;  %v769_v30 = vsub.s32 1, %v762_v26 }
 0x102   :  { %v418_v42 = vadd.f32 %v417_v37, %v416_v34  ;;  %v724_v49 = vadd.f32 %v723_v41, %v721_v40  ;;  %v777_v33 = vsub.s32 2, %v762_v26  ;;  %v785_v35 = vsub.s32 3, %v762_v26 }
 0x103   :  { %v522_v44 = vadd.f32 %v521_v46, %v520_v36  ;;  %v621_v52 = vrot.slane %v620_v43, 4  ;;  %v793_v48 = vsub.s32 4, %v762_v26  ;;  %v801_v40 = vsub.s32 5, %v762_v26 }
 0x104   :  { %v734_v51 = vsel %vm733_vm2, %v732_v50, %v418_v42  ;;  %v725_v54 = vrot.slane %v724_v49, 4 }
 0x105   :  { %v736_v53 = vsel %vm735_vm3, %v734_v51, %v522_v44  ;;  %v622_v55 = vadd.f32 %v621_v52, %v620_v43 }
 0x106   :  { %v726_v12 = vadd.f32 %v725_v54, %v724_v49 }
 0x107   :  { %v623_v56 = vrot.slane %v622_v55, 2 }
 0x108   :  { %v727_v58 = vrot.slane %v726_v12, 2 }
 0x109   :  { %v624_v47 = vadd.f32 %v623_v56, %v622_v55 }
 0x10a   :  { %v728_v59 = vadd.f32 %v727_v58, %v726_v12 }
 0x10b   :  { %v625_v60 = vrot.slane %v624_v47, 1 }
 0x10c   :  { %v729_v61 = vrot.slane %v728_v59, 1 }
 0x10d   :  { %v626_v23 = vadd.f32 %v625_v60, %v624_v47 }
 0x10e   :  { %v730_v62 = vadd.f32 %v729_v61, %v728_v59 }
 0x10f   :  { %v738_v63 = vsel %vm737_vm4, %v736_v53, %v626_v23 }
 0x110   :  { %v740_v45 = vsel %vm739_vm5, %v738_v63, %v730_v62  ;;  %v812_v62 = vpop.permute.xlu0 %811  ;;  %v817_v63 = vpop.permute.xlu1 %816 }
 0x111   :  { %v742_v0 = vsel %vm741_vm6, %v740_v45, -inf }
 0x112   :  { %v743_v1 = vrot.slane %v742_v0, 4 }
 0x114   :  { %v744_v2 = vmax.f32 %v742_v0, %v743_v1 }
 0x116   :  { %v745_v3 = vrot.slane %v744_v2, 2 }
 0x118   :  { %v746_v4 = vmax.f32 %v744_v2, %v745_v3 }
 0x11a   :  { %v747_v5 = vrot.slane %v746_v4, 1 }
 0x11c   :  { %v748_v6 = vmax.f32 %v746_v4, %v747_v5 }
 0x11e   :  { %v749_v7 = vsub.f32 %v740_v45, %v748_v6 }
 0x120   :  { %v750_v8 = vmul.f32 1.442695, %v749_v7 }
 0x122   :  { %1014 = vpow2.f32 %v750_v8 }
 0x12c   :  { %v1015_v9 = vpop.eup %1014 }
 0x12d   :  { %v752_v10 = vsel %vm741_vm6, %v1015_v9, 0.0 }
 0x12e   :  { %v753_v11 = vrot.slane %v752_v10, 4 }
 0x130   :  { %v754_v57 = vadd.f32 %v753_v11, %v752_v10 }
 0x132   :  { %v755_v13 = vrot.slane %v754_v57, 2 }
 0x134   :  { %v756_v14 = vadd.f32 %v755_v13, %v754_v57 }
 0x136   :  { %v757_v17 = vrot.slane %v756_v14, 1 }
 0x138   :  { %v758_v50 = vadd.f32 %v757_v17, %v756_v14 }
 0x13a   :  { %1016 = vrcp.f32 %v758_v50 }
 0x144   :  { %v1017_v34 = vpop.eup %1016 }
 0x145   :  { %v760_v36 = vmul.f32 %v1017_v34, %v1015_v9 }
 0x147   :  { %v764_v37 = vrot.slane %v760_v36, %v763_v27  ;;  %v770_v38 = vrot.slane %v760_v36, %v769_v30  ;;  %v778_v39 = vrot.slane %v760_v36, %v777_v33  ;;  %v786_v46 = vrot.slane %v760_v36, %v785_v35 }
 0x148   :  { %v794_v49 = vrot.slane %v760_v36, %v793_v48  ;;  %v802_v55 = vrot.slane %v760_v36, %v801_v40 }
 0x149   :  { %v765_v41 = vmul.f32 %v764_v37, %v1082_v15  ;;  %v766_v42 = vmul.f32 %v764_v37, %v1084_v16  ;;  %v771_v43 = vmul.f32 %v770_v38, %v1089_v18  ;;  %v772_v44 = vmul.f32 %v770_v38, %v1091_v19 }
 0x14a   :  { %v779_v53 = vmul.f32 %v778_v39, %v1093_v20  ;;  %v780_v54 = vmul.f32 %v778_v39, %v1095_v21  ;;  %v787_v58 = vmul.f32 %v786_v46, %v1102_v24  ;;  %v788_v15 = vmul.f32 %v786_v46, %v1104_v25 }
 0x14b   :  { %v773_v51 = vadd.f32 %v771_v43, %v765_v41  ;;  %v774_v52 = vadd.f32 %v772_v44, %v766_v42  ;;  %v795_v18 = vmul.f32 %v794_v49, %v1110_v28  ;;  %v796_v19 = vmul.f32 %v794_v49, %v1112_v29  ;;  %v828_v29 = vld [vmem:[%s1268_s1] sm:$0x1] }
 0x14c   :  { %v803_v61 = vmul.f32 %v802_v55, %v1116_v31  ;;  %v804_v20 = vmul.f32 %v802_v55, %v1118_v32 }
 0x14d   :  { %v781_v12 = vadd.f32 %v779_v53, %v773_v51  ;;  %v782_v56 = vadd.f32 %v780_v54, %v774_v52 }
 0x14f   :  { %v789_v47 = vadd.f32 %v787_v58, %v781_v12  ;;  %v790_v16 = vadd.f32 %v788_v15, %v782_v56 }
 0x151   :  { %v797_v59 = vadd.f32 %v795_v18, %v789_v47  ;;  %v798_v60 = vadd.f32 %v796_v19, %v790_v16 }
 0x153   :  { %v805_v21 = vadd.f32 %v803_v61, %v797_v59  ;;  %v806_v23 = vadd.f32 %v804_v20, %v798_v60 }
 0x155   :  { %v819_v45 = vmul.f32 %v812_v62, %v805_v21  ;;  %v820_v24 = vmul.f32 %v817_v63, %v806_v23 }
 0x157   :  { %v821_v0 = vadd.f32 %v820_v24, %v819_v45 }
 0x159   :  { %v822_v25 = vrot.slane %v821_v0, 4 }
 0x15b   :  { %v823_v1 = vadd.f32 %v822_v25, %v821_v0 }
 0x15d   :  { %v824_v2 = vrot.slane %v823_v1, 2 }
 0x15f   :  { %v825_v3 = vadd.f32 %v824_v2, %v823_v1 }
 0x161   :  { %v826_v28 = vrot.slane %v825_v3, 1 }
 0x163   :  { %v827_v4 = vadd.f32 %v826_v28, %v825_v3 }
 0x165   :  { %v829_v31 = vadd.f32 %v828_v29, %v827_v4 }
 0x167   :  { %v871_v5 = vmul.f32 -1.442695, %v829_v31 }
 0x169   :  { %1018 = vpow2.f32 %v871_v5 }
 0x173   :  { %v1019_v32 = vpop.eup %1018 }
 0x174   :  { %v833_v6 = vadd.f32 1.0, %v1019_v32 }
 0x176   :  { %1020 = vrcp.f32 %v833_v6 }
 0x180   :  { %v1021_v7 = vpop.eup %1020 }
 0x181   :  { %836 = vst [vmem:[%s1269_s6] sm:$0x1] %v1021_v7 }

</bundles_post_ra>
